<compile_context>
chip_gen: v7x
topology: tpu7x:2x2x1
jax: 0.10.0
libtpu: 0.0.40
codegen_flags: <defaults>
</compile_context>

<pallas_src>
import jax
import jax.numpy as jnp
from jax.experimental import pallas as pl
from jax.experimental.pallas import tpu as pltpu


# ----------------------------- Pallas kernel --------------------------------
def _conv1x1_kernel(x_ref, w_ref, b_ref, o_ref):
    # (Cout, Cin) @ (Cin, TN) -> (Cout, TN), f32 accumulate; bias is (Cout, 1).
    acc = jnp.dot(w_ref[...], x_ref[...], preferred_element_type=jnp.float32)
    o_ref[...] = (acc + b_ref[...]).astype(o_ref.dtype)


# ----------------------------- tiling helpers --------------------------------
def _round_up(x, m):
    return ((x + m - 1) // m) * m


def _sublanes(dtype):
    # Sub-32-bit dtypes pack along sublanes: f32 -> 8, bf16 -> 16, int8 -> 32.
    return max(8, 32 // jnp.dtype(dtype).itemsize)


def _vmem_budget_bytes():
    """(working-set budget, scoped vmem limit) per TPU generation."""
    cap = None
    try:
        cap = getattr(pltpu.get_tpu_info(), "vmem_capacity_bytes", None)
    except Exception:
        cap = None
    if cap and cap > (64 << 20):
        return 32 << 20, 48 << 20          # v5e / v6e: 128 MiB physical VMEM
    return 24 << 20, 32 << 20              # v7x (64 MiB) or unknown: stay tight


def _pick_tile_n(n, cin, cout, x_dtype, w_dtype, b_dtype, out_dtype, budget):
    """Largest lane tile whose padded, double-buffered working set fits budget."""
    x_it = jnp.dtype(x_dtype).itemsize
    w_it = jnp.dtype(w_dtype).itemsize
    b_it = jnp.dtype(b_dtype).itemsize
    o_it = jnp.dtype(out_dtype).itemsize
    # Resident (double-buffered) weight + bias blocks, sublane/lane padded.
    fixed = 2 * _round_up(cout, _sublanes(w_dtype)) * _round_up(cin, 128) * w_it
    fixed += 2 * _round_up(cout, _sublanes(b_dtype)) * 128 * b_it
    # Per lane-column cost of the double-buffered x / out blocks (sublane padded).
    per_col = 2 * (_round_up(cin, _sublanes(x_dtype)) * x_it
                   + _round_up(cout, _sublanes(out_dtype)) * o_it)
    avail = max(budget - fixed, per_col * 128)
    max_cols = avail // per_col
    if n <= max_cols:
        return n                                   # full row: block == array dim
    return max(128, (max_cols // 128) * 128)       # lane aligned; ragged tail OK


# ----------------------------- Pallas wrapper --------------------------------
def conv1x1_pallas(x, w, b):
    """Per-pixel channel matmul, channels-first / lane-dense.

    x: (B, Cin, N) with N = Ho*Wo;  w: (Cout, Cin);  b: (Cout,).
    Returns (B, Cout, N) in x.dtype.
    """
    bsz, cin, n = x.shape
    cout = w.shape[0]
    # Keep the MXU feed in the activation dtype (bf16 path stays bf16); f32 acc.
    w = w.astype(x.dtype)
    b = b.astype(jnp.float32).reshape(cout, 1)

    budget, vmem_limit = _vmem_budget_bytes()
    tile_n = _pick_tile_n(n, cin, cout, x.dtype, w.dtype, b.dtype, x.dtype, budget)
    # Guarantee >= 2 grid steps so both v7x TensorCores get work (memory-bound).
    if bsz * ((n + tile_n - 1) // tile_n) < 2 and n > 128:
        tile_n = min(tile_n, max(128, _round_up((n + 1) // 2, 128)))
    grid = (bsz, pl.cdiv(n, tile_n))

    x_it = jnp.dtype(x.dtype).itemsize
    cost = pl.CostEstimate(
        flops=2 * bsz * cout * cin * n,
        transcendentals=0,
        bytes_accessed=bsz * n * (cin + cout) * x_it + cout * cin * x_it + cout * 4)

    return pl.pallas_call(
        _conv1x1_kernel,
        out_shape=jax.ShapeDtypeStruct((bsz, cout, n), x.dtype),
        grid_spec=pltpu.PrefetchScalarGridSpec(
            num_scalar_prefetch=0,
            grid=grid,
            in_specs=[
                # Batch dim squeezed out of the kernel ref; pixel axis on lanes.
                pl.BlockSpec((None, cin, tile_n), lambda bi, ni: (bi, 0, ni)),
                # Weight / bias: constant index_map -> DMA'd once, stays resident.
                pl.BlockSpec((cout, cin), lambda bi, ni: (0, 0)),
                pl.BlockSpec((cout, 1), lambda bi, ni: (0, 0)),
            ],
            out_specs=pl.BlockSpec((None, cout, tile_n),
                                   lambda bi, ni: (bi, 0, ni)),
        ),
        compiler_params=pltpu.CompilerParams(
            dimension_semantics=("parallel", "parallel"),
            vmem_limit_bytes=vmem_limit),
        cost_estimate=cost,
    )(x, w, b)


def conv1x1(x, w, b):
    """Entry point with a small-problem bypass (x: (B, Cin, N))."""
    bsz, cin, n = x.shape
    cout = w.shape[0]
    # Sub-128-lane outputs force masked vst.msk stores and the fixed per-call /
    # per-grid-step cost dominates tiny problems; a fused XLA einsum wins there.
    if n < 128 or bsz * cout * n < 32768:
        acc = jnp.einsum("oc,bcn->bon", w.astype(jnp.float32), x.astype(jnp.float32))
        return (acc + b.astype(jnp.float32)[None, :, None]).astype(x.dtype)
    return conv1x1_pallas(x, w, b)


# ----------------------------- glue helpers ---------------------------------
def _reverse_space_to_depth(frames, temporal_block_size=1, spatial_block_size=1):
    """Pure data-movement depth->space rearrange (plain JAX glue)."""
    dh = dw = spatial_block_size
    dt = temporal_block_size
    if frames.ndim == 4:
        # 'b (dh dw c) h w -> b c (h dh) (w dw)'
        bsz, cc, h, w = frames.shape
        c = cc // (dh * dw)
        x = frames.reshape(bsz, dh, dw, c, h, w)
        x = jnp.transpose(x, (0, 3, 4, 1, 5, 2))  # b c h dh w dw
        return x.reshape(bsz, c, h * dh, w * dw)
    elif frames.ndim == 5:
        # 'b t (dt dh dw c) h w -> b (t dt) c (h dh) (w dw)'
        bsz, t, cc, h, w = frames.shape
        c = cc // (dt * dh * dw)
        x = frames.reshape(bsz, t, dt, dh, dw, c, h, w)
        x = jnp.transpose(x, (0, 1, 2, 5, 6, 3, 7, 4))  # b t dt c h dh w dw
        return x.reshape(bsz, t * dt, c, h * dh, w * dw)
    raise ValueError("Frames should be of rank 4 or 5")


class ImageDecoder:
    """JAX/Pallas re-implementation of perceiver_pytorch ImageDecoder forward."""

    def __init__(self, postprocess_type="pixels", spatial_upsample=1,
                 temporal_upsample=1, output_channels=-1, input_channels=12,
                 input_reshape_size=None, key=None):
        if postprocess_type not in ("conv", "patches", "pixels", "conv1x1"):
            raise ValueError("Invalid postprocess_type!")
        self.postprocess_type = postprocess_type
        self.spatial_upsample = spatial_upsample
        self.temporal_upsample = temporal_upsample
        self.input_reshape_size = input_reshape_size
        self.input_channels = input_channels
        self.output_channels = output_channels

        if postprocess_type == "conv1x1":
            if output_channels == -1:
                raise ValueError("Expected value for output_channels")
            if key is None:
                key = jax.random.PRNGKey(0)
            kw, kb = jax.random.split(key)
            # Deterministic synthetic init (Conv2d param shapes: weight
            # (Cout, Cin, 1, 1), bias (Cout,)) -- stored channels-first (Cout, Cin).
            bound = 1.0 / (input_channels ** 0.5)
            self.w = jax.random.uniform(
                kw, (output_channels, input_channels), jnp.float32, -bound, bound)
            self.b = jax.random.uniform(
                kb, (output_channels,), jnp.float32, -bound, bound)
        elif postprocess_type == "conv":
            # TODO(synk): Conv2DUpsample / Conv3DUpsample definitions were not
            # provided in the reference source; 'conv' path is not implemented.
            raise NotImplementedError("conv postprocess_type not implemented")

    # ---- conv1x1 path: strided 1x1 conv == strided subsample + matmul ------
    def _conv1x1_nchw(self, x):
        s = self.spatial_upsample  # Conv2d stride in the reference module
        if s != 1:
            # TODO(synk): fuse this stride-s subsample into the kernel DMA; a
            # lane-strided read is not cleanly expressible with BlockSpec, so
            # it stays a single XLA slice pass for now (no effect when s == 1).
            x = x[:, :, ::s, ::s]                     # (B, Cin, Ho, Wo)
        b_, cin, ho, wo = x.shape
        # Channels-first pixel slab (B, Cin, Ho*Wo): no NCHW<->NHWC transpose.
        out = conv1x1(x.reshape(b_, cin, ho * wo), self.w, self.b)
        return out.reshape(b_, self.w.shape[0], ho, wo)   # already NCHW

    def __call__(self, inputs):
        if self.input_reshape_size is not None:
            inputs = jnp.reshape(
                inputs,
                [inputs.shape[0]] + list(self.input_reshape_size) + [inputs.shape[-1]])

        if self.postprocess_type == "pixels":
            return inputs

        if self.postprocess_type == "patches":
            return _reverse_space_to_depth(
                inputs, self.temporal_upsample, self.spatial_upsample)

        if self.postprocess_type == "conv1x1":
            if inputs.ndim == 5:
                # PyTorch loops over time and stacks; equivalent to merging
                # (B, T) into the batch axis for a 1x1 conv.
                b_, t = inputs.shape[:2]
                merged = inputs.reshape((b_ * t,) + inputs.shape[2:])
                out = self._conv1x1_nchw(merged)
                return out.reshape((b_, t) + out.shape[1:])
            return self._conv1x1_nchw(inputs)

        raise NotImplementedError(self.postprocess_type)


# --------------------------------- main --------------------------------------
if __name__ == "__main__":
    key = jax.random.PRNGKey(0)
    kx, kp, kv = jax.random.split(key, 3)

    B, Cin, H, W = 2, 4, 128, 128
    Cout = 8
    stride = 2  # spatial_upsample acts as the Conv2d stride in conv1x1
    HI = jax.lax.Precision.HIGHEST

    decoder = ImageDecoder(
        postprocess_type="conv1x1",
        spatial_upsample=stride,
        output_channels=Cout,
        input_channels=Cin,
        key=kp,
    )

    # 4-D image path (goes through the Pallas kernel: N = 64*64 = 4096 lanes).
    x = jax.random.normal(kx, (B, Cin, H, W), jnp.float32)
    out = jax.block_until_ready(decoder(x))
    xs = x[:, :, ::stride, ::stride]
    ref = (jnp.einsum("bchw,oc->bohw", xs, decoder.w, precision=HI)
           + decoder.b[None, :, None, None])
    assert out.shape == (B, Cout, H // stride, W // stride), out.shape
    assert jnp.allclose(out, ref, atol=2e-2, rtol=2e-2)

    # 5-D video path (per-frame conv1x1, stacked along time).
    T = 2
    xv = jax.random.normal(kv, (B, T, Cin, H, W), jnp.float32)
    outv = jax.block_until_ready(decoder(xv))
    xvs = xv[:, :, :, ::stride, ::stride]
    refv = (jnp.einsum("btchw,oc->btohw", xvs, decoder.w, precision=HI)
            + decoder.b[None, None, :, None, None])
    assert outv.shape == (B, T, Cout, H // stride, W // stride), outv.shape
    assert jnp.allclose(outv, refv, atol=2e-2, rtol=2e-2)

    # Small-problem bypass path (N = 64 lanes < 128 -> fused XLA einsum).
    xsmall = jax.random.normal(kx, (1, Cin, 16, 16), jnp.float32)
    out_s = jax.block_until_ready(decoder(xsmall))
    ref_s = (jnp.einsum("bchw,oc->bohw", xsmall[:, :, ::stride, ::stride],
                        decoder.w, precision=HI)
             + decoder.b[None, :, None, None])
    assert out_s.shape == (1, Cout, 8, 8), out_s.shape
    assert jnp.allclose(out_s, ref_s, atol=2e-2, rtol=2e-2)

    # 'patches' / 'pixels' paths (pure data movement glue).
    patches = ImageDecoder(postprocess_type="patches", spatial_upsample=2)
    px = jax.random.normal(kx, (2, 16, 8, 8), jnp.float32)
    pout = jax.block_until_ready(patches(px))
    assert pout.shape == (2, 4, 16, 16), pout.shape
    pixels = ImageDecoder(postprocess_type="pixels")
    assert jax.block_until_ready(pixels(px)).shape == px.shape

    print("KERNEL_OK")
</pallas_src>

<mosaic_0001>
module attributes {stable_mosaic.version = 11 : i64} {
  func.func @_conv1x1_kernel(%arg0: i32, %arg1: i32, %arg2: memref<1x4x4096xf32, #tpu.memory_space<vmem>>, %arg3: memref<8x4xf32, #tpu.memory_space<vmem>>, %arg4: memref<8x1xf32, #tpu.memory_space<vmem>>, %arg5: memref<1x8x4096xf32, #tpu.memory_space<vmem>>) attributes {dimension_semantics = [#tpu.dimension_semantics<parallel>, #tpu.dimension_semantics<parallel>], iteration_bounds = array<i64: 2, 1>, scalar_prefetch = 0 : i64, scratch_operands = 0 : i64, tpu.core_type = #tpu.core_type<tc>, window_params = [{transform_indices = @transform_0, window_bounds = array<i64: 1, 4, 4096>}, {pipeline_mode = #tpu.pipeline_mode<synchronous>, transform_indices = @transform_1, window_bounds = array<i64: 8, 4>}, {pipeline_mode = #tpu.pipeline_mode<synchronous>, transform_indices = @transform_2, window_bounds = array<i64: 8, 1>}, {transform_indices = @transform_3, window_bounds = array<i64: 1, 8, 4096>}]} {
    %c0 = arith.constant 0 : index
    %c0_0 = arith.constant 0 : index
    %0 = vector.load %arg3[%c0, %c0_0] : memref<8x4xf32, #tpu.memory_space<vmem>>, vector<8x4xf32>
    %c0_1 = arith.constant 0 : index
    %c0_2 = arith.constant 0 : index
    %c0_3 = arith.constant 0 : index
    %1 = vector.load %arg2[%c0_1, %c0_2, %c0_3] : memref<1x4x4096xf32, #tpu.memory_space<vmem>>, vector<1x4x4096xf32>
    %2 = vector.shape_cast %1 : vector<1x4x4096xf32> to vector<4x4096xf32>
    %cst = arith.constant dense<0.000000e+00> : vector<8x4096xf32>
    %3 = tpu.matmul %0, %2, %cst {dimension_numbers = #tpu.dot_dimension_numbers<[1], [0], [0], [1], [0, 0, 1, 1], [], []>} : vector<8x4xf32>, vector<4x4096xf32>, vector<8x4096xf32> -> vector<8x4096xf32>
    %c0_4 = arith.constant 0 : index
    %c0_5 = arith.constant 0 : index
    %4 = vector.load %arg4[%c0_4, %c0_5] : memref<8x1xf32, #tpu.memory_space<vmem>>, vector<8x1xf32>
    %5 = vector.broadcast %4 : vector<8x1xf32> to vector<8x4096xf32>
    %6 = arith.addf %3, %5 : vector<8x4096xf32>
    %c0_6 = arith.constant 0 : index
    %c0_7 = arith.constant 0 : index
    %c0_8 = arith.constant 0 : index
    %7 = vector.load %arg5[%c0_6, %c0_7, %c0_8] : memref<1x8x4096xf32, #tpu.memory_space<vmem>>, vector<1x8x4096xf32>
    %8 = vector.shape_cast %7 : vector<1x8x4096xf32> to vector<8x4096xf32>
    %9 = vector.shape_cast %6 : vector<8x4096xf32> to vector<1x8x4096xf32>
    tpu.vector_store %arg5[%c0_6, %c0_7, %c0_8], %9 {strides = array<i32>} : memref<1x8x4096xf32, #tpu.memory_space<vmem>>, vector<1x8x4096xf32>,
    return
  }
  func.func @transform_0(%arg0: i32, %arg1: i32) -> (i32, i32, i32) {
    %c0_i32 = arith.constant 0 : i32
    %c0_i32_0 = arith.constant 0 : i32
    return %arg0, %c0_i32, %arg1 : i32, i32, i32
  }
  func.func @transform_1(%arg0: i32, %arg1: i32) -> (i32, i32) {
    %c0_i32 = arith.constant 0 : i32
    %c0_i32_0 = arith.constant 0 : i32
    %c0_i32_1 = arith.constant 0 : i32
    return %c0_i32, %c0_i32_0 : i32, i32
  }
  func.func @transform_2(%arg0: i32, %arg1: i32) -> (i32, i32) {
    %c0_i32 = arith.constant 0 : i32
    %c0_i32_0 = arith.constant 0 : i32
    %c0_i32_1 = arith.constant 0 : i32
    return %c0_i32, %c0_i32_0 : i32, i32
  }
  func.func @transform_3(%arg0: i32, %arg1: i32) -> (i32, i32, i32) {
    %c0_i32 = arith.constant 0 : i32
    %c0_i32_0 = arith.constant 0 : i32
    return %arg0, %c0_i32, %arg1 : i32, i32, i32
  }
}

</mosaic_0001>

<bundles_post_ra>
// kernel: tpu_custom_call.1
= control target key start
LH: loop header
LB: loop body
LE: loop exit
PB: predicated region body
PF: predicated region fallthrough
CT: control target
= control target key end

     0   :  { %8 = vsyncpa [#allocation3], 0  ;;  %s2232_s0 = inlined_call_operand.hbm [shape: f32[2,4,4096], index: 0, kind: input, shape index: {}]   ;;  %s2233_s1 = inlined_call_operand.vmem [shape: f32[8,4], index: 1, kind: input, shape index: {}]   ;;  %s2234_s2 = inlined_call_operand.vmem [shape: f32[8,1], index: 2, kind: input, shape index: {}]   ;;  %s2235_s3 = inlined_call_operand.hbm [shape: f32[2,8,4096], index: 3, kind: output, shape index: {}]  }
   0x1   :  { %10 = vsyncpa [#allocation3 + $0x1], 0 }
   0x2   :  { %11 = vsyncpa [#allocation4], 0 }
   0x3   :  { %13 = vsyncpa [#allocation4 + $0x1], 0  ;;  %s1884_s12 = smov 0   ;;  %s1886_s13 = smov 0  }
   0x4   :  { %s1888_s14 = smov 0   ;;  %s1890_s15 = smov 0  }
   0x5   :  { %s1892_s16 = smov 0   ;;  %s1894_s17 = smov 0  }
   0x6 LB: > { %s1600_s18 = sadd.s32 4294967295, %s1858_s17   ;;  %s1601_s19 = sadd.s32 4294967294, %s1858_s17   ;;  %s1858_s17 = sphi %s1894_s17, %s19_s17   ;;  %s1854_s16 = sphi %s1892_s16, %s2251_s16   ;;  %s1850_s15 = sphi %s1890_s15, %s2250_s15   ;;  %s1846_s14 = sphi %s1888_s14, %s2249_s14   ;;  %s1842_s13 = sphi %s1886_s13, %s2248_s13   ;;  %s1838_s12 = sphi %s1884_s12, %s2247_s12  }
   0x7   : > { %s31_s20 = sadd.s32 1, %s1854_s16  ;;  %s40_s21 = sadd.s32 1, %s1846_s14 }
   0x8   : > { %p33_p0 = scmp.ge.s32.totalorder %s31_s20, 2  ;;  %p47_p1 = scmp.ne.s32.totalorder %s1846_s14, %s1842_s13 }
   0x9   : > { %p48_p2 = scmp.eq.s32.totalorder %s1858_s17, 0  ;;  %p53_p3 = scmp.ne.s32.totalorder %s1842_s13, %s1838_s12 }
   0xa   : > { %s2253_s20 = smov (%p33_p0, %s31_s20), 0  ;;  %p54_p5 = scmp.eq.s32.totalorder %s1600_s18, 0 }
   0xb   : > { %p1925_p4 = por %p48_p2, %p47_p1  ;;  %s35_s23 = ssub.s32 %s1854_s16, %s2253_s20 }
   0xc   : > { %p121_p6 = scmp.eq.s32.totalorder %s1600_s18, 1  ;;  %p38_p7 = scmp.eq.s32.totalorder %s35_s23, 0 }
   0xd   : > { %p1931_p8 = por %p54_p5, %p53_p3  ;;  %p127_p10 = scmp.eq.s32.totalorder %s1601_s19, 1 }
   0xe   : > { %p1935_p9 = por %p121_p6, %p47_p1  ;;  %p1677_p13 = scmp.lt.s32.totalorder %s1858_s17, 2 }
   0xf   : > { %s1940_s26 = scalar_select %p38_p7, %s1846_s14, %s40_s21  }
  0x10   : > { %s2239_s25 = scalar_select %p1935_p9, 1, 0 }
  0x11   : > { %p1942_p11 = por %p127_p10, %p53_p3  ;;  %s153_s28 = sand.u32 1, %s1846_s14  }
  0x12   : > { %s1604_s29 = sshll.u32 %s153_s28, 7  ;;  %s1663_s30 = sshll.u32 %s1854_s16, 11 }
  0x13   : > { %s2240_s27 = scalar_select %p1942_p11, 1, 0 }
  0x14   : > { %s1953_s6 = scalar_lea.hbm %s2232_s0, %s1663_s30  ;;  %s157_s7 = scalar_lea.vmem [#allocation2], %s1604_s29 }
  0x15   : > { %s167_s8 = sshll.u32 %s157_s7, 4  ;;  %p1959_p0 = pnand %p1677_p13, %p1925_p4  ;;  %s1955_s8 = int_to_ptr.vmem [resolvable:$true] %s167_s8 }
  0x16   : > { %s154_s10 = scalar_lea.sflag [#allocation3], %s153_s28  ;;  %s1746_s11 = scalar_lea.hbm %s1953_s6, 2048 }
  0x17   : > { %p1747_p3 = scmp.ne.s32.totalorder %s1953_s6, %s1746_s11  ;;  %p1748_p5 = pneg %p1959_p0 }
  0x18   : > { %s1751_s21 = scalar_lea.hbm %s2232_s0, 4096  ;;  %p1752_p4 = scmp.lt.u32.totalorder %s1953_s6, %s2232_s0 }
  0x19   : > { %p1749_p6 = pnand %p1748_p5, %p1747_p3  ;;  %p1753_p10 = scmp.lt.u32.totalorder %s1751_s21, %s1746_s11 }
  0x1a   : > { %p1755_p12 = scmp.lt.u32.totalorder %s1746_s11, %s1953_s6 }
  0x1b   : > { %p1750_p7 = pneg %p1749_p6  ;;  %p1754_p13 = por %p1753_p10, %p1752_p4 }
  0x1d   : > { %p1756_p1 = por %p1755_p12, %p1754_p13 }
  0x1f   : > { %p1757_p2 = pnand %p1756_p1, %p1750_p7 }
  0x21   : > { %1760 = shalt.err (!%p1757_p2)
}
  0x22   : > { %s1761_s28 = scalar_lea.vmem %s1955_s8, 2048  ;;  %s1860_s29 = smov [#allocation2]  }
  0x23   : > { %p1762_p3 = scmp.ne.s32.totalorder %s1955_s8, %s1761_s28  ;;  %s1766_s30 = sshll.u32 %s1860_s29, 4  ;;  %s1767_s30 = int_to_ptr.vmem [resolvable:$false] %s1766_s30 }
  0x24   : > { %s1768_s4 = scalar_lea.vmem %s1767_s30, 4096  ;;  %p1769_p9 = scmp.lt.s32.totalorder %s1955_s8, %s1767_s30 }
  0x25   : > { %p1764_p6 = pnand %p1762_p3, %p1748_p5  ;;  %p1770_p4 = scmp.lt.s32.totalorder %s1768_s4, %s1761_s28 }
  0x27   : > { %p1765_p11 = pneg %p1764_p6  ;;  %p1771_p10 = por %p1770_p4, %p1769_p9 }
  0x29   : > { %p1772_p12 = pnand %p1771_p10, %p1765_p11 }
  0x2b   : > { %1775 = shalt.err (!%p1772_p12)
}
  0x2c   : > { %1672 = dma.hbm_to_vmem [thread:$0]  (!%p1959_p0), %s1953_s6, 2048, %s1955_s8, %s154_s10  }
  0x2d   : > { %p2242_p1 = scmp.lt.s32.totalorder %s1858_s17, 3  ;;  %p2243_p2 = scmp.ge.s32.totalorder %s1858_s17, 1 }
  0x2f   : > { %p173_p5 = pnand %p2243_p2, %p2242_p1 }
  0x30   : > { %s1995_s5 = sand.u32 (!%p173_p5), 1, %s1842_s13  }
  0x31   : > { %176 = sbr.rel (%p173_p5) target bundleno = 319 (0x13f), region = 32  ;;  %s1608_s7 = sshll.u32 (!%p173_p5), %s1995_s5, 7 }
  0x32   : > { %s179_s11 = scalar_lea.sflag (!%p173_p5), [#allocation3], %s1995_s5  ;;  %s1999_s18 = scalar_lea.vmem (!%p173_p5), [#allocation2], %s1608_s7 }
  0x38   : > { %1829 = dma.done.wait (%p1931_p8), %s179_s11, 2048  }
  0x39   : > { %1831 = vsyncadd (%p1931_p8), %s179_s11, 4294965248  ;;  %v1861_v0 = vmov 0.0   ;;  %v1862_v1 = vmov 0   ;;  %v208_v2 = vld [vmem:[%s1999_s18] sm:$0xff]  ;;  %vm266_vm0 = vcmask 1043456   ;;  %v209_v3 = vld [vmem:[%s1999_s18 + $0x8] sm:$0xff] }
  0x3a   : > { %395 = vmatprep.mubr.f32.mxu0 %v1861_v0  ;;  %466 = vmatprep.mubr.f32.mxu1 %v1861_v0  ;;  %v246_v4 = vcombine.high %v208_v2, %v208_v2  ;;  %v247_v5 = vcombine.high %v209_v3, %v209_v3  ;;  %v210_v6 = vld [vmem:[%s1999_s18 + $0x10] sm:$0xff]  ;;  %v211_v7 = vld [vmem:[%s1999_s18 + $0x18] sm:$0xff]  ;;  %v2014_v8 = vld [vmem:[%s2233_s1] sm:$0xff]  ;;  %vm262_vm1 = vcmask 31744   ;;  %s1609_s10 = sshll.u32 %s1995_s5, 8  ;;  %s1664_s21 = sshll.u32 %s1850_s15, 12 }
  0x3b   : > { %1729 = vset.pattern.permute.xlu0 %v1862_v1  ;;  %v248_v9 = vcombine.high %v210_v6, %v210_v6  ;;  %v249_v10 = vcombine.high %v211_v7, %v211_v7  ;;  %v212_v11 = vld [vmem:[%s1999_s18 + $0x20] sm:$0xff]  ;;  %v213_v12 = vld [vmem:[%s1999_s18 + $0x28] sm:$0xff]  ;;  %v214_v15 = vld [vmem:[%s1999_s18 + $0x30] sm:$0xff]  ;;  %s2116_s19 = scalar_lea.vmem [#allocation5], %s1609_s10  ;;  %s2179_s28 = scalar_lea.hbm %s2235_s3, %s1664_s21 }
  0x3c   : > { %1610 = vmatprep.subr.msk.mxu0 %vm266_vm0, %v246_v4  ;;  %1613 = vmatprep.subr.msk.mxu1 %vm266_vm0, %v247_v5  ;;  %v250_v13 = vcombine.high %v212_v11, %v212_v11  ;;  %v251_v14 = vcombine.high %v213_v12, %v213_v12  ;;  %v215_v16 = vld [vmem:[%s1999_s18 + $0x38] sm:$0xff]  ;;  %v252_v17 = vcombine.high %v214_v15, %v214_v15  ;;  %v216_v19 = vld [vmem:[%s1999_s18 + $0x40] sm:$0xff]  ;;  %v217_v20 = vld [vmem:[%s1999_s18 + $0x48] sm:$0xff]  ;;  %s1516_s22 = sshll.u32 %s2116_s19, 4  ;;  %s1500_s29 = scalar_lea.sflag [#allocation4], %s1995_s5  ;;  %s2181_s22 = int_to_ptr.vmem [resolvable:$true] %s1516_s22 }
  0x3d   : > { %1611 = vmatpush1.msk.msra.mxu0 %vm266_vm0, %v208_v2  ;;  %1614 = vmatpush1.msk.msra.mxu1 %vm266_vm0, %v209_v3  ;;  %v253_v18 = vcombine.high %v215_v16, %v215_v16  ;;  %v254_v21 = vcombine.high %v216_v19, %v216_v19  ;;  %v255_v22 = vcombine.high %v217_v20, %v217_v20  ;;  %v218_v23 = vld [vmem:[%s1999_s18 + $0x50] sm:$0xff]  ;;  %v219_v24 = vld [vmem:[%s1999_s18 + $0x58] sm:$0xff]  ;;  %v220_v27 = vld [vmem:[%s1999_s18 + $0x60] sm:$0xff]  ;;  %s1776_s30 = scalar_lea.vmem %s2181_s22, 4096  ;;  %p2244_p9 = scmp.ne.s32.totalorder %s2239_s25, 0 }
  0x3e   : > { %1612 = vmatmul.mubr.msk.f32.vlgmr.msra.gmra.mrb[0].mxu0 %vm262_vm1, %v2014_v8  ;;  %1615 = vmatmul.mubr.msk.f32.vlgmr.msra.gmra.mrb[0].mxu1 %vm262_vm1, %v2014_v8  ;;  %v256_v25 = vcombine.high %v218_v23, %v218_v23  ;;  %v257_v26 = vcombine.high %v219_v24, %v219_v24  ;;  %v221_v28 = vld [vmem:[%s1999_s18 + $0x68] sm:$0xff]  ;;  %v258_v29 = vcombine.high %v220_v27, %v220_v27  ;;  %v222_v31 = vld [vmem:[%s1999_s18 + $0x70] sm:$0xff]  ;;  %v223_v32 = vld [vmem:[%s1999_s18 + $0x78] sm:$0xff]  ;;  %p1777_p8 = scmp.ne.s32.totalorder %s2181_s22, %s1776_s30  ;;  %s1863_s4 = smov [#allocation5]  }
  0x3f   : > { %1616 = vmatprep.subr.msk.mxu0 %vm266_vm0, %v248_v9  ;;  %1619 = vmatprep.subr.msk.mxu1 %vm266_vm0, %v249_v10  ;;  %v259_v30 = vcombine.high %v221_v28, %v221_v28  ;;  %v260_v33 = vcombine.high %v222_v31, %v222_v31  ;;  %v261_v34 = vcombine.high %v223_v32, %v223_v32  ;;  %v224_v35 = vld [vmem:[%s2234_s2] sm:$0xff]  ;;  %s1780_s7 = sshll.u32 %s1863_s4, 4  ;;  %s1781_s7 = int_to_ptr.vmem [resolvable:$false] %s1780_s7 }
  0x40   : > { %1617 = vmatpush1.msk.msra.mxu0 %vm266_vm0, %v210_v6  ;;  %1620 = vmatpush1.msk.msra.mxu1 %vm266_vm0, %v211_v7  ;;  %p1778_p11 = pnand %p1777_p8, %p2244_p9  ;;  %s1782_s11 = scalar_lea.vmem %s1781_s7, 8192 }
  0x41   : > { %537 = vmatprep.mubr.f32.mxu0 %v1861_v0  ;;  %608 = vmatprep.mubr.f32.mxu1 %v1861_v0  ;;  %p1783_p7 = scmp.lt.s32.totalorder %s2181_s22, %s1781_s7  ;;  %p1784_p13 = scmp.lt.s32.totalorder %s1782_s11, %s1776_s30 }
  0x42   : > { %1618 = vmatmul.mubr.msk.f32.vlgmr.msra.gmra.mrb[2].mxu0 %vm262_vm1, %v2014_v8  ;;  %1621 = vmatmul.mubr.msk.f32.vlgmr.msra.gmra.mrb[2].mxu1 %vm262_vm1, %v2014_v8  ;;  %p1779_p0 = pneg %p1778_p11 }
  0x43   : > { %1622 = vmatprep.subr.msk.mxu0 %vm266_vm0, %v250_v13  ;;  %1625 = vmatprep.subr.msk.mxu1 %vm266_vm0, %v251_v14  ;;  %p1785_p3 = por %p1784_p13, %p1783_p7 }
  0x44   : > { %1623 = vmatpush1.msk.msra.mxu0 %vm266_vm0, %v212_v11  ;;  %1626 = vmatpush1.msk.msra.mxu1 %vm266_vm0, %v213_v12 }
  0x45   : > { %679 = vmatprep.mubr.f32.mxu0 %v1861_v0  ;;  %750 = vmatprep.mubr.f32.mxu1 %v1861_v0  ;;  %p1786_p6 = pnand %p1785_p3, %p1779_p0 }
  0x46   : > { %1624 = vmatmul.mubr.msk.f32.vlgmr.msra.gmra.mrb[4].mxu0 %vm262_vm1, %v2014_v8  ;;  %1627 = vmatmul.mubr.msk.f32.vlgmr.msra.gmra.mrb[4].mxu1 %vm262_vm1, %v2014_v8 }
  0x47   : > { %1628 = vmatprep.subr.msk.mxu0 %vm266_vm0, %v252_v17  ;;  %1631 = vmatprep.subr.msk.mxu1 %vm266_vm0, %v253_v18 }
  0x48   : > { %1629 = vmatpush1.msk.msra.mxu0 %vm266_vm0, %v214_v15  ;;  %1632 = vmatpush1.msk.msra.mxu1 %vm266_vm0, %v215_v16 }
  0x49   : > { %821 = vmatprep.mubr.f32.mxu0 %v1861_v0  ;;  %892 = vmatprep.mubr.f32.mxu1 %v1861_v0 }
  0x4a   : > { %1630 = vmatmul.mubr.msk.f32.vlgmr.msra.gmra.mrb[6].mxu0 %vm262_vm1, %v2014_v8  ;;  %1633 = vmatmul.mubr.msk.f32.vlgmr.msra.gmra.mrb[6].mxu1 %vm262_vm1, %v2014_v8 }
  0x4b   : > { %1634 = vmatprep.subr.msk.mxu0 %vm266_vm0, %v254_v21  ;;  %1637 = vmatprep.subr.msk.mxu1 %vm266_vm0, %v255_v22 }
  0x4c   : > { %1635 = vmatpush1.msk.msra.mxu0 %vm266_vm0, %v216_v19  ;;  %1638 = vmatpush1.msk.msra.mxu1 %vm266_vm0, %v217_v20 }
  0x4d   : > { %963 = vmatprep.mubr.f32.mxu0 %v1861_v0  ;;  %1034 = vmatprep.mubr.f32.mxu1 %v1861_v0 }
  0x4e   : > { %1636 = vmatmul.mubr.msk.f32.vlgmr.msra.gmra.mrb[8].mxu0 %vm262_vm1, %v2014_v8  ;;  %1639 = vmatmul.mubr.msk.f32.vlgmr.msra.gmra.mrb[8].mxu1 %vm262_vm1, %v2014_v8 }
  0x4f   : > { %1640 = vmatprep.subr.msk.mxu0 %vm266_vm0, %v256_v25  ;;  %1643 = vmatprep.subr.msk.mxu1 %vm266_vm0, %v257_v26 }
  0x50   : > { %1641 = vmatpush1.msk.msra.mxu0 %vm266_vm0, %v218_v23  ;;  %1644 = vmatpush1.msk.msra.mxu1 %vm266_vm0, %v219_v24 }
  0x51   : > { %1105 = vmatprep.mubr.f32.mxu0 %v1861_v0  ;;  %1176 = vmatprep.mubr.f32.mxu1 %v1861_v0 }
  0x52   : > { %1642 = vmatmul.mubr.msk.f32.vlgmr.msra.gmra.mrb[10].mxu0 %vm262_vm1, %v2014_v8  ;;  %1645 = vmatmul.mubr.msk.f32.vlgmr.msra.gmra.mrb[10].mxu1 %vm262_vm1, %v2014_v8 }
  0x53   : > { %1646 = vmatprep.subr.msk.mxu0 %vm266_vm0, %v258_v29  ;;  %1649 = vmatprep.subr.msk.mxu1 %vm266_vm0, %v259_v30 }
  0x54   : > { %1647 = vmatpush1.msk.msra.mxu0 %vm266_vm0, %v220_v27  ;;  %1650 = vmatpush1.msk.msra.mxu1 %vm266_vm0, %v221_v28 }
  0x55   : > { %1247 = vmatprep.mubr.f32.mxu0 %v1861_v0  ;;  %1318 = vmatprep.mubr.f32.mxu1 %v1861_v0 }
  0x56   : > { %1648 = vmatmul.mubr.msk.f32.vlgmr.msra.gmra.mrb[12].mxu0 %vm262_vm1, %v2014_v8  ;;  %1651 = vmatmul.mubr.msk.f32.vlgmr.msra.gmra.mrb[12].mxu1 %vm262_vm1, %v2014_v8 }
  0x57   : > { %1652 = vmatprep.subr.msk.mxu0 %vm266_vm0, %v260_v33  ;;  %1655 = vmatprep.subr.msk.mxu1 %vm266_vm0, %v261_v34 }
  0x58   : > { %1653 = vmatpush1.msk.msra.mxu0 %vm266_vm0, %v222_v31  ;;  %1656 = vmatpush1.msk.msra.mxu1 %vm266_vm0, %v223_v32 }
  0x59   : > { %1389 = vmatprep.mubr.f32.mxu0 %v1861_v0  ;;  %1460 = vmatprep.mubr.f32.mxu1 %v1861_v0 }
  0x5a   : > { %1654 = vmatmul.mubr.msk.f32.vlgmr.msra.gmra.mrb[14].mxu0 %vm262_vm1, %v2014_v8  ;;  %1657 = vmatmul.mubr.msk.f32.vlgmr.msra.gmra.mrb[14].mxu1 %vm262_vm1, %v2014_v8 }
  0x5b   : > { %227 = vperm.xlu0 %1729, %v224_v35  }
  0xda   : > { %v2110_v36 = vpop.permute.xlu0 %227 }
 0x111   : > { %v397_v37 = vpop.f32.mrb[0].mxu0  ;;  %v468_v38 = vpop.f32.mrb[0].mxu1 }
 0x112   : > { %v398_v39 = vadd.f32 %v397_v37, %v2110_v36  ;;  %v469_v40 = vadd.f32 %v468_v38, %v2110_v36  ;;  %v399_v41 = vpop.f32.mrb[1].mxu0  ;;  %v470_v42 = vpop.f32.mrb[1].mxu1 }
 0x113   : > { %v400_v43 = vadd.f32 %v399_v41, %v2110_v36  ;;  %v471_v44 = vadd.f32 %v470_v42, %v2110_v36 }
 0x114   : > { %1467 = vst [vmem:[%s2116_s19] sm:$0xff] %v398_v39  ;;  %1469 = vst [vmem:[%s2116_s19 + $0x10] sm:$0xff] %v469_v40 }
 0x115   : > { %1468 = vst [vmem:[%s2116_s19 + $0x8] sm:$0xff] %v400_v43  ;;  %1470 = vst [vmem:[%s2116_s19 + $0x18] sm:$0xff] %v471_v44  ;;  %v539_v45 = vpop.f32.mrb[2].mxu0  ;;  %v610_v46 = vpop.f32.mrb[2].mxu1 }
 0x116   : > { %v540_v47 = vadd.f32 %v539_v45, %v2110_v36  ;;  %v611_v48 = vadd.f32 %v610_v46, %v2110_v36  ;;  %v541_v49 = vpop.f32.mrb[3].mxu0  ;;  %v612_v50 = vpop.f32.mrb[3].mxu1 }
 0x117   : > { %v542_v51 = vadd.f32 %v541_v49, %v2110_v36  ;;  %v613_v52 = vadd.f32 %v612_v50, %v2110_v36 }
 0x118   : > { %1471 = vst [vmem:[%s2116_s19 + $0x20] sm:$0xff] %v540_v47  ;;  %1473 = vst [vmem:[%s2116_s19 + $0x30] sm:$0xff] %v611_v48 }
 0x119   : > { %1472 = vst [vmem:[%s2116_s19 + $0x28] sm:$0xff] %v542_v51  ;;  %1474 = vst [vmem:[%s2116_s19 + $0x38] sm:$0xff] %v613_v52  ;;  %v681_v53 = vpop.f32.mrb[4].mxu0  ;;  %v752_v54 = vpop.f32.mrb[4].mxu1 }
 0x11a   : > { %v682_v55 = vadd.f32 %v681_v53, %v2110_v36  ;;  %v753_v56 = vadd.f32 %v752_v54, %v2110_v36  ;;  %v683_v57 = vpop.f32.mrb[5].mxu0  ;;  %v754_v58 = vpop.f32.mrb[5].mxu1 }
 0x11b   : > { %v684_v59 = vadd.f32 %v683_v57, %v2110_v36  ;;  %v755_v60 = vadd.f32 %v754_v58, %v2110_v36 }
 0x11c   : > { %1475 = vst [vmem:[%s2116_s19 + $0x40] sm:$0xff] %v682_v55  ;;  %1477 = vst [vmem:[%s2116_s19 + $0x50] sm:$0xff] %v753_v56 }
 0x11d   : > { %1476 = vst [vmem:[%s2116_s19 + $0x48] sm:$0xff] %v684_v59  ;;  %1478 = vst [vmem:[%s2116_s19 + $0x58] sm:$0xff] %v755_v60  ;;  %v823_v61 = vpop.f32.mrb[6].mxu0  ;;  %v894_v62 = vpop.f32.mrb[6].mxu1 }
 0x11e   : > { %v824_v63 = vadd.f32 %v823_v61, %v2110_v36  ;;  %v895_v0 = vadd.f32 %v894_v62, %v2110_v36  ;;  %v825_v1 = vpop.f32.mrb[7].mxu0  ;;  %v896_v2 = vpop.f32.mrb[7].mxu1 }
 0x11f   : > { %v826_v3 = vadd.f32 %v825_v1, %v2110_v36  ;;  %v897_v4 = vadd.f32 %v896_v2, %v2110_v36 }
 0x120   : > { %1479 = vst [vmem:[%s2116_s19 + $0x60] sm:$0xff] %v824_v63  ;;  %1481 = vst [vmem:[%s2116_s19 + $0x70] sm:$0xff] %v895_v0 }
 0x121   : > { %1480 = vst [vmem:[%s2116_s19 + $0x68] sm:$0xff] %v826_v3  ;;  %1482 = vst [vmem:[%s2116_s19 + $0x78] sm:$0xff] %v897_v4  ;;  %v965_v5 = vpop.f32.mrb[8].mxu0  ;;  %v1036_v6 = vpop.f32.mrb[8].mxu1 }
 0x122   : > { %v966_v7 = vadd.f32 %v965_v5, %v2110_v36  ;;  %v1037_v8 = vadd.f32 %v1036_v6, %v2110_v36  ;;  %v967_v9 = vpop.f32.mrb[9].mxu0  ;;  %v1038_v10 = vpop.f32.mrb[9].mxu1 }
 0x123   : > { %v968_v11 = vadd.f32 %v967_v9, %v2110_v36  ;;  %v1039_v12 = vadd.f32 %v1038_v10, %v2110_v36 }
 0x124   : > { %1483 = vst [vmem:[%s2116_s19 + $0x80] sm:$0xff] %v966_v7  ;;  %1485 = vst [vmem:[%s2116_s19 + $0x90] sm:$0xff] %v1037_v8 }
 0x125   : > { %1484 = vst [vmem:[%s2116_s19 + $0x88] sm:$0xff] %v968_v11  ;;  %1486 = vst [vmem:[%s2116_s19 + $0x98] sm:$0xff] %v1039_v12  ;;  %v1107_v13 = vpop.f32.mrb[10].mxu0  ;;  %v1178_v14 = vpop.f32.mrb[10].mxu1 }
 0x126   : > { %v1108_v15 = vadd.f32 %v1107_v13, %v2110_v36  ;;  %v1179_v16 = vadd.f32 %v1178_v14, %v2110_v36  ;;  %v1109_v17 = vpop.f32.mrb[11].mxu0  ;;  %v1180_v18 = vpop.f32.mrb[11].mxu1 }
 0x127   : > { %v1110_v19 = vadd.f32 %v1109_v17, %v2110_v36  ;;  %v1181_v20 = vadd.f32 %v1180_v18, %v2110_v36 }
 0x128   : > { %1487 = vst [vmem:[%s2116_s19 + $0xa0] sm:$0xff] %v1108_v15  ;;  %1489 = vst [vmem:[%s2116_s19 + $0xb0] sm:$0xff] %v1179_v16 }
 0x129   : > { %1488 = vst [vmem:[%s2116_s19 + $0xa8] sm:$0xff] %v1110_v19  ;;  %1490 = vst [vmem:[%s2116_s19 + $0xb8] sm:$0xff] %v1181_v20  ;;  %v1249_v21 = vpop.f32.mrb[12].mxu0  ;;  %v1320_v22 = vpop.f32.mrb[12].mxu1 }
 0x12a   : > { %v1250_v23 = vadd.f32 %v1249_v21, %v2110_v36  ;;  %v1321_v24 = vadd.f32 %v1320_v22, %v2110_v36  ;;  %v1251_v25 = vpop.f32.mrb[13].mxu0  ;;  %v1322_v26 = vpop.f32.mrb[13].mxu1 }
 0x12b   : > { %v1252_v27 = vadd.f32 %v1251_v25, %v2110_v36  ;;  %v1323_v28 = vadd.f32 %v1322_v26, %v2110_v36 }
 0x12c   : > { %1491 = vst [vmem:[%s2116_s19 + $0xc0] sm:$0xff] %v1250_v23  ;;  %1493 = vst [vmem:[%s2116_s19 + $0xd0] sm:$0xff] %v1321_v24 }
 0x12d   : > { %1492 = vst [vmem:[%s2116_s19 + $0xc8] sm:$0xff] %v1252_v27  ;;  %1494 = vst [vmem:[%s2116_s19 + $0xd8] sm:$0xff] %v1323_v28  ;;  %v1391_v29 = vpop.f32.mrb[14].mxu0  ;;  %v1462_v30 = vpop.f32.mrb[14].mxu1 }
 0x12e   : > { %v1392_v31 = vadd.f32 %v1391_v29, %v2110_v36  ;;  %v1463_v32 = vadd.f32 %v1462_v30, %v2110_v36  ;;  %v1393_v33 = vpop.f32.mrb[15].mxu0  ;;  %v1464_v34 = vpop.f32.mrb[15].mxu1 }
 0x12f   : > { %v1394_v35 = vadd.f32 %v1393_v33, %v2110_v36  ;;  %v1465_v37 = vadd.f32 %v1464_v34, %v2110_v36 }
 0x130   : > { %1495 = vst [vmem:[%s2116_s19 + $0xe0] sm:$0xff] %v1392_v31  ;;  %1497 = vst [vmem:[%s2116_s19 + $0xf0] sm:$0xff] %v1463_v32 }
 0x131   : > { %1496 = vst [vmem:[%s2116_s19 + $0xe8] sm:$0xff] %v1394_v35  ;;  %1498 = vst [vmem:[%s2116_s19 + $0xf8] sm:$0xff] %v1465_v37 }
 0x132   : > { %1789 = shalt.err (!%p1786_p6)
}
 0x133   : > { %s1790_s5 = scalar_lea.hbm %s2179_s28, 4096  ;;  %s1794_s6 = scalar_lea.hbm %s2235_s3, 8192 }
 0x134   : > { %p1791_p4 = scmp.ne.s32.totalorder %s2179_s28, %s1790_s5  ;;  %p1795_p1 = scmp.lt.u32.totalorder %s2179_s28, %s2235_s3 }
 0x135   : > { %p1796_p2 = scmp.lt.u32.totalorder %s1794_s6, %s1790_s5  ;;  %p1798_p8 = scmp.lt.u32.totalorder %s1790_s5, %s2179_s28 }
 0x136   : > { %p1792_p10 = pnand %p1791_p4, %p2244_p9 }
 0x137   : > { %p1797_p5 = por %p1796_p2, %p1795_p1 }
 0x138   : > { %p1793_p12 = pneg %p1792_p10 }
 0x139   : > { %p1799_p11 = por %p1798_p8, %p1797_p5 }
 0x13b   : > { %p1800_p0 = pnand %p1799_p11, %p1793_p12 }
 0x13d   : > { %1803 = shalt.err (!%p1800_p0)
}
 0x13e   : > { %1667 = dma.vmem_to_hbm [thread:$0]  (%p2244_p9), %s2181_s22, 4096, %s2179_s28, %s1500_s29  }
 0x13f PF: > { %s1528_s10 = sand.u32 1, %s1838_s12   ;;  %p2245_p7 = scmp.ne.s32.totalorder %s2240_s27, 0 }
 0x140   : > { %p2246_p13 = scmp.ge.s32.totalorder %s1858_s17, 2  ;;  %s1529_s19 = scalar_lea.sflag [#allocation4], %s1528_s10 }
 0x142   : > { %p1674_p3 = pnand %p2246_p13, %p2245_p7 }
 0x144   : > { %1833 = dma.done.wait (!%p1674_p3), %s1529_s19, 4096  }
 0x145   : > { %1835 = vsyncadd (!%p1674_p3), %s1529_s19, 4294963200  ;;  %s19_s17 = sadd.s32 1, %s1858_s17   ;;  %s2247_s12 = smov %s1842_s13 }
 0x146   : > { %p16_p6 = scmp.ge.s32.totalorder %s19_s17, 4   ;;  %s2248_s13 = smov %s1846_s14 }
 0x147   : > { %s2249_s14 = smov %s1940_s26  ;;  %s2250_s15 = smov %s1854_s16 }
 0x148   : > { %s2251_s16 = smov %s2253_s20  ;;  %18 = sbr.rel (!%p16_p6) target bundleno = 6 (0x6), region = 77 }
 0x14f   :  { %1534 = vsyncpa [#allocation3], 1 }
 0x150   :  { %1536 = vsyncpa [#allocation3 + $0x1], 1 }
 0x151   :  { %1537 = vsyncpa [#allocation4], 1 }
 0x152   :  { %1539 = vsyncpa [#allocation4 + $0x1], 1 }

</bundles_post_ra>
